<compile_context>
chip_gen: v6e
topology: v6e:2x2x1
jax: 0.10.0
libtpu: 0.0.40
codegen_flags: <defaults>
</compile_context>

<pallas_src>
import functools

import numpy as np
import jax
import jax.numpy as jnp
from jax import lax
from jax.experimental import pallas as pl
from jax.experimental.pallas import tpu as pltpu


# ----------------------------------------------------------------------------
# Reference helpers (replicate the PyTorch module exactly; numpy only)
# ----------------------------------------------------------------------------
def make_btv_kernels(win_size: int, channels: int, decay: float = 0.7) -> np.ndarray:
    """Replicates BTV.__init__'s 'kernels' buffer: shape (K, channels, win, win)."""
    assert win_size % 2 == 1
    c0 = win_size // 2
    ks = []
    for i in range(win_size):
        for j in range(win_size):
            if i != j:
                k = np.zeros((win_size, win_size), dtype=np.float32)
                k[i, j] = 1.0
                k[c0, c0] = -1.0
                k *= decay ** (abs(i - c0) + abs(j - c0))
                ks.append(k)
    ker = np.stack(ks, axis=0)[:, None, :, :]
    ker = np.broadcast_to(ker, (ker.shape[0], channels, win_size, win_size))
    return np.ascontiguousarray(ker).astype(np.float32)


def btv_reference(x: np.ndarray, kernels: np.ndarray, win_size: int) -> float:
    """Pure-numpy replica of BTV.forward for verification."""
    C, H, W = x.shape
    K = kernels.shape[0]
    pad = win_size // 2
    xpad = np.pad(x, ((0, 0), (pad, pad), (pad, pad)))
    total = np.zeros((H, W), np.float32)
    for k in range(K):
        acc = np.zeros((H, W), np.float32)
        for c in range(C):
            for p in range(win_size):
                for q in range(win_size):
                    acc += kernels[k, c, p, q] * xpad[c, p:p + H, q:q + W]
        total += np.abs(acc)
    return float(total.mean())


# ----------------------------------------------------------------------------
# Trace-time constants
# ----------------------------------------------------------------------------
def _round_up(x: int, m: int) -> int:
    return ((x + m - 1) // m) * m


def _btv_tap_groups(win_size: int, decay: float):
    """Window offsets (i, j) with i != j, grouped by their (positive) decay weight."""
    c0 = win_size // 2
    groups = {}
    for i in range(win_size):
        for j in range(win_size):
            if i != j:
                d = float(decay ** (abs(i - c0) + abs(j - c0)))
                groups.setdefault(d, []).append((i, j))
    return tuple(sorted((d, tuple(offs)) for d, offs in groups.items()))


# ----------------------------------------------------------------------------
# Pallas kernel: one row tile per grid step
# ----------------------------------------------------------------------------
def _btv_tile_kernel(main_ref, halo_ref, out_ref, shf_ref, *,
                     groups, pad, tile_h, w_out, w_valid, h_total, num_tiles):
    # main_ref: (tile_h, WL) f32 -- Spad rows [t*tile_h, (t+1)*tile_h)
    # halo_ref: (EH, WL)     f32 -- Spad rows [(t+1)*tile_h, (t+1)*tile_h + EH)
    # out_ref:  (8, WO)      f32 -- per-column partial sums for this tile (lane dense)
    # shf_ref:  (win, tile_h + 2*pad, WO) f32 scratch -- column-shifted slabs
    win = 2 * pad + 1

    # Hoisted column shifts: build `win` lane-shifted copies of this tile's halo'd
    # slab once (win lane relayouts instead of K = win^2 - win misaligned slices).
    for j in range(win):
        shf_ref[j, 0:tile_h, :] = main_ref[:, j:j + w_out]
        shf_ref[j, tile_h:tile_h + 2 * pad, :] = halo_ref[0:2 * pad, j:j + w_out]

    # Center tap shared by every k: Spad[r + pad, w + pad].
    center = shf_ref[pad, pad:pad + tile_h, :]

    # Running accumulation: one accumulator per decay group, folded into a running
    # total, so liveness stays at ~4 (tile_h, WO) slabs regardless of win.
    total = None
    for d, offsets in groups:
        acc = None
        for (i, j) in offsets:
            diff = jnp.abs(shf_ref[j, i:i + tile_h, :] - center)
            acc = diff if acc is None else acc + diff
        scaled = acc * jnp.float32(d)
        total = scaled if total is None else total + scaled

    def finalize(tot):
        # Reduce the tile's rows down to 8 sublanes and zero the lane-padding
        # columns (>= W) so the wrapper can safely sum the whole output array.
        red = jnp.sum(tot.reshape(tile_h // 8, 8, w_out), axis=0)
        col = lax.broadcasted_iota(jnp.int32, (8, w_out), 1)
        return jnp.where(col < w_valid, red, 0.0)

    if h_total % tile_h == 0:
        # Every tile is a full tile: no row masking anywhere (trace-time decision).
        out_ref[...] = finalize(total)
    else:
        last = num_tiles - 1
        valid_last = h_total - last * tile_h      # static
        t = pl.program_id(0)

        @pl.when(t != last)
        def _():
            out_ref[...] = finalize(total)

        @pl.when(t == last)
        def _():
            row = lax.broadcasted_iota(jnp.int32, (tile_h, 1), 0)
            out_ref[...] = finalize(jnp.where(row < valid_last, total, 0.0))


# ----------------------------------------------------------------------------
# Wrapper
# ----------------------------------------------------------------------------
def _vmem_capacity_bytes() -> int:
    try:
        cap = int(pltpu.get_tpu_info().vmem_capacity_bytes)
        if cap > 0:
            return cap
    except Exception:
        pass
    return 64 * 1024 * 1024        # conservative fallback (v7x per-core VMEM)


def _choose_tile_h(H: int, WL: int, win: int, budget_bytes: int, EH: int) -> int:
    # Live f32 footprint per tile row: 2 double-buffered input rows (WL wide) +
    # `win` shifted-slab rows (WO ~= WL wide) + ~4 live value slabs
    # (center / group acc / running total / temp).
    per_row = (win + 6) * WL * 4
    rows = (budget_bytes // per_row) // EH * EH
    rows = max(EH, min(rows, 512, _round_up(max(H, 1), EH)))
    # Prefer >= 2 row tiles so both TensorCores get work on v7x.
    if H >= 2 * EH and rows >= _round_up(H, EH):
        rows = max(EH, _round_up((H + 1) // 2, EH))
    return int(rows)


def btv_forward(x: jax.Array, win_size: int, decay: float = 0.7,
                tile_h: int | None = None) -> jax.Array:
    """x: (C, H, W) float32 -> scalar, identical to BTV(win_size, C, decay).forward(x)."""
    assert x.ndim == 3 and win_size % 2 == 1
    C, H, W = x.shape
    pad = win_size // 2
    x = x.astype(jnp.float32)

    WO = _round_up(W, 128)                       # lane-dense compute/output width
    WL = WO + _round_up(2 * pad, 128)            # input width (room for column shifts)
    EH = max(8, _round_up(2 * pad, 8))           # bottom-halo block height

    cap = _vmem_capacity_bytes()
    vmem_limit = max(32 * 1024 * 1024, min(cap * 3 // 4, 96 * 1024 * 1024))
    if tile_h is None:
        tile_h = _choose_tile_h(H, WL, win_size, (vmem_limit * 7) // 10, EH)
    tile_h = max(EH, _round_up(int(tile_h), EH))

    num_tiles = (H + tile_h - 1) // tile_h
    HT = num_tiles * tile_h
    HP = HT + EH

    # BTV conv weights are identical across channels -> conv of x with the
    # (K, C, win, win) kernels equals conv of the channel sum S with the
    # single-channel kernels.  Channel sum + zero padding fuse into one XLA pass.
    S = jnp.sum(x, axis=0)                                               # (H, W)
    Spad = jnp.pad(S, ((pad, HP - H - pad), (pad, WL - W - pad)))        # (HP, WL)

    groups = _btv_tap_groups(win_size, decay)
    kernel = functools.partial(
        _btv_tile_kernel, groups=groups, pad=pad, tile_h=tile_h,
        w_out=WO, w_valid=W, h_total=H, num_tiles=num_tiles)

    partials = pl.pallas_call(
        kernel,
        out_shape=jax.ShapeDtypeStruct((num_tiles, 8, WO), jnp.float32),
        grid=(num_tiles,),
        in_specs=[
            # Main tile_h-row block of the padded channel-sum image.
            pl.BlockSpec((tile_h, WL), lambda t: (t, 0)),
            # Small extra block right below it, supplying the 2*pad halo rows.
            pl.BlockSpec((EH, WL), lambda t: ((t + 1) * (tile_h // EH), 0)),
        ],
        out_specs=pl.BlockSpec((None, 8, WO), lambda t: (t, 0, 0)),
        scratch_shapes=[pltpu.VMEM((win_size, tile_h + 2 * pad, WO), jnp.float32)],
        compiler_params=pltpu.CompilerParams(
            dimension_semantics=("parallel",),     # independent tiles; 2 TCs on v7x
            vmem_limit_bytes=int(vmem_limit)),
    )(Spad, Spad)

    # Junk columns are zeroed in-kernel and partial rows are masked, so a plain
    # full sum is exact; final scalar reduction in f32 in the wrapper.
    return jnp.sum(partials) / (H * W)


# NOTE: BTV.update_weights is a no-op in the reference module; nothing to implement.

if __name__ == "__main__":
    key = jax.random.PRNGKey(0)

    # Case 1: win=3, C=4, 16x16, forced tile_h=8 -> 2 full row tiles.
    win_size, channels, decay = 3, 4, 0.7
    H = W = 16
    x = jax.random.normal(key, (channels, H, W), dtype=jnp.float32)
    out = jax.block_until_ready(btv_forward(x, win_size, decay=decay, tile_h=8))
    ref = btv_reference(np.asarray(x), make_btv_kernels(win_size, channels, decay), win_size)
    assert np.allclose(float(out), ref, rtol=1e-4, atol=1e-5), (float(out), ref)

    # Case 2: non-multiple H (partial last tile -> pl.when masked path), W not 128-aligned.
    channels2, H2, W2 = 3, 12, 20
    x2 = jax.random.normal(jax.random.PRNGKey(1), (channels2, H2, W2), dtype=jnp.float32)
    out2 = jax.block_until_ready(btv_forward(x2, 3, decay=decay, tile_h=8))
    ref2 = btv_reference(np.asarray(x2), make_btv_kernels(3, channels2, decay), 3)
    assert np.allclose(float(out2), ref2, rtol=1e-4, atol=1e-5), (float(out2), ref2)

    # Case 3: win=5 (K=20 taps, 4 decay groups), auto-chosen tile_h.
    channels3 = 2
    x3 = jax.random.normal(jax.random.PRNGKey(2), (channels3, 16, 16), dtype=jnp.float32)
    out3 = jax.block_until_ready(btv_forward(x3, 5, decay=decay))
    ref3 = btv_reference(np.asarray(x3), make_btv_kernels(5, channels3, decay), 5)
    assert np.allclose(float(out3), ref3, rtol=1e-4, atol=1e-5), (float(out3), ref3)

    print("KERNEL_OK")
</pallas_src>

<mosaic_0001>
module attributes {stable_mosaic.version = 11 : i64} {
  func.func @_btv_tile_kernel(%arg0: i32, %arg1: memref<8x256xf32, #tpu.memory_space<vmem>>, %arg2: memref<8x256xf32, #tpu.memory_space<vmem>>, %arg3: memref<1x8x128xf32, #tpu.memory_space<vmem>>, %arg4: memref<3x10x128xf32, #tpu.memory_space<vmem>>) attributes {dimension_semantics = [#tpu.dimension_semantics<parallel>], iteration_bounds = array<i64: 2>, scalar_prefetch = 0 : i64, scratch_operands = 1 : i64, tpu.core_type = #tpu.core_type<tc>, window_params = [{transform_indices = @transform_0, window_bounds = array<i64: 8, 256>}, {transform_indices = @transform_1, window_bounds = array<i64: 8, 256>}, {transform_indices = @transform_2, window_bounds = array<i64: 1, 8, 128>}]} {
    %c0 = arith.constant 0 : index
    %c0_0 = arith.constant 0 : index
    %0 = vector.load %arg1[%c0, %c0_0] : memref<8x256xf32, #tpu.memory_space<vmem>>, vector<8x128xf32>
    %c0_1 = arith.constant 0 : index
    %c0_2 = arith.constant 0 : index
    %c0_3 = arith.constant 0 : index
    %1 = vector.load %arg4[%c0_1, %c0_2, %c0_3] : memref<3x10x128xf32, #tpu.memory_space<vmem>>, vector<1x8x128xf32>
    %2 = vector.shape_cast %1 : vector<1x8x128xf32> to vector<8x128xf32>
    %3 = vector.shape_cast %0 : vector<8x128xf32> to vector<1x8x128xf32>
    tpu.vector_store %arg4[%c0_1, %c0_2, %c0_3], %3 {strides = array<i32>} : memref<3x10x128xf32, #tpu.memory_space<vmem>>, vector<1x8x128xf32>,
    %c0_4 = arith.constant 0 : index
    %c0_5 = arith.constant 0 : index
    %4 = vector.load %arg2[%c0_4, %c0_5] : memref<8x256xf32, #tpu.memory_space<vmem>>, vector<2x128xf32>
    %c0_6 = arith.constant 0 : index
    %c8 = arith.constant 8 : index
    %c0_7 = arith.constant 0 : index
    %5 = vector.load %arg4[%c0_6, %c8, %c0_7] : memref<3x10x128xf32, #tpu.memory_space<vmem>>, vector<1x2x128xf32>
    %6 = vector.shape_cast %5 : vector<1x2x128xf32> to vector<2x128xf32>
    %7 = vector.shape_cast %4 : vector<2x128xf32> to vector<1x2x128xf32>
    tpu.vector_store %arg4[%c0_6, %c8, %c0_7], %7 {strides = array<i32>} : memref<3x10x128xf32, #tpu.memory_space<vmem>>, vector<1x2x128xf32>,
    %c0_8 = arith.constant 0 : index
    %c1 = arith.constant 1 : index
    %8 = vector.load %arg1[%c0_8, %c1] : memref<8x256xf32, #tpu.memory_space<vmem>>, vector<8x128xf32>
    %c1_9 = arith.constant 1 : index
    %c0_10 = arith.constant 0 : index
    %c0_11 = arith.constant 0 : index
    %9 = vector.load %arg4[%c1_9, %c0_10, %c0_11] : memref<3x10x128xf32, #tpu.memory_space<vmem>>, vector<1x8x128xf32>
    %10 = vector.shape_cast %9 : vector<1x8x128xf32> to vector<8x128xf32>
    %11 = vector.shape_cast %8 : vector<8x128xf32> to vector<1x8x128xf32>
    tpu.vector_store %arg4[%c1_9, %c0_10, %c0_11], %11 {strides = array<i32>} : memref<3x10x128xf32, #tpu.memory_space<vmem>>, vector<1x8x128xf32>,
    %c0_12 = arith.constant 0 : index
    %c1_13 = arith.constant 1 : index
    %12 = vector.load %arg2[%c0_12, %c1_13] : memref<8x256xf32, #tpu.memory_space<vmem>>, vector<2x128xf32>
    %c1_14 = arith.constant 1 : index
    %c8_15 = arith.constant 8 : index
    %c0_16 = arith.constant 0 : index
    %13 = vector.load %arg4[%c1_14, %c8_15, %c0_16] : memref<3x10x128xf32, #tpu.memory_space<vmem>>, vector<1x2x128xf32>
    %14 = vector.shape_cast %13 : vector<1x2x128xf32> to vector<2x128xf32>
    %15 = vector.shape_cast %12 : vector<2x128xf32> to vector<1x2x128xf32>
    tpu.vector_store %arg4[%c1_14, %c8_15, %c0_16], %15 {strides = array<i32>} : memref<3x10x128xf32, #tpu.memory_space<vmem>>, vector<1x2x128xf32>,
    %c0_17 = arith.constant 0 : index
    %c2 = arith.constant 2 : index
    %16 = vector.load %arg1[%c0_17, %c2] : memref<8x256xf32, #tpu.memory_space<vmem>>, vector<8x128xf32>
    %c2_18 = arith.constant 2 : index
    %c0_19 = arith.constant 0 : index
    %c0_20 = arith.constant 0 : index
    %17 = vector.load %arg4[%c2_18, %c0_19, %c0_20] : memref<3x10x128xf32, #tpu.memory_space<vmem>>, vector<1x8x128xf32>
    %18 = vector.shape_cast %17 : vector<1x8x128xf32> to vector<8x128xf32>
    %19 = vector.shape_cast %16 : vector<8x128xf32> to vector<1x8x128xf32>
    tpu.vector_store %arg4[%c2_18, %c0_19, %c0_20], %19 {strides = array<i32>} : memref<3x10x128xf32, #tpu.memory_space<vmem>>, vector<1x8x128xf32>,
    %c0_21 = arith.constant 0 : index
    %c2_22 = arith.constant 2 : index
    %20 = vector.load %arg2[%c0_21, %c2_22] : memref<8x256xf32, #tpu.memory_space<vmem>>, vector<2x128xf32>
    %c2_23 = arith.constant 2 : index
    %c8_24 = arith.constant 8 : index
    %c0_25 = arith.constant 0 : index
    %21 = vector.load %arg4[%c2_23, %c8_24, %c0_25] : memref<3x10x128xf32, #tpu.memory_space<vmem>>, vector<1x2x128xf32>
    %22 = vector.shape_cast %21 : vector<1x2x128xf32> to vector<2x128xf32>
    %23 = vector.shape_cast %20 : vector<2x128xf32> to vector<1x2x128xf32>
    tpu.vector_store %arg4[%c2_23, %c8_24, %c0_25], %23 {strides = array<i32>} : memref<3x10x128xf32, #tpu.memory_space<vmem>>, vector<1x2x128xf32>,
    %c1_26 = arith.constant 1 : index
    %c1_27 = arith.constant 1 : index
    %c0_28 = arith.constant 0 : index
    %24 = vector.load %arg4[%c1_26, %c1_27, %c0_28] : memref<3x10x128xf32, #tpu.memory_space<vmem>>, vector<1x8x128xf32>
    %25 = vector.shape_cast %24 : vector<1x8x128xf32> to vector<8x128xf32>
    %c2_29 = arith.constant 2 : index
    %c0_30 = arith.constant 0 : index
    %c0_31 = arith.constant 0 : index
    %26 = vector.load %arg4[%c2_29, %c0_30, %c0_31] : memref<3x10x128xf32, #tpu.memory_space<vmem>>, vector<1x8x128xf32>
    %27 = vector.shape_cast %26 : vector<1x8x128xf32> to vector<8x128xf32>
    %28 = arith.subf %27, %25 : vector<8x128xf32>
    %29 = math.absf %28 : vector<8x128xf32>
    %c0_32 = arith.constant 0 : index
    %c2_33 = arith.constant 2 : index
    %c0_34 = arith.constant 0 : index
    %30 = vector.load %arg4[%c0_32, %c2_33, %c0_34] : memref<3x10x128xf32, #tpu.memory_space<vmem>>, vector<1x8x128xf32>
    %31 = vector.shape_cast %30 : vector<1x8x128xf32> to vector<8x128xf32>
    %32 = arith.subf %31, %25 : vector<8x128xf32>
    %33 = math.absf %32 : vector<8x128xf32>
    %34 = arith.addf %29, %33 : vector<8x128xf32>
    %cst = arith.constant 4.900000e-01 : f32
    %35 = vector.broadcast %cst : f32 to vector<8x128xf32>
    %36 = arith.mulf %34, %35 : vector<8x128xf32>
    %c1_35 = arith.constant 1 : index
    %c0_36 = arith.constant 0 : index
    %c0_37 = arith.constant 0 : index
    %37 = vector.load %arg4[%c1_35, %c0_36, %c0_37] : memref<3x10x128xf32, #tpu.memory_space<vmem>>, vector<1x8x128xf32>
    %38 = vector.shape_cast %37 : vector<1x8x128xf32> to vector<8x128xf32>
    %39 = arith.subf %38, %25 : vector<8x128xf32>
    %40 = math.absf %39 : vector<8x128xf32>
    %c0_38 = arith.constant 0 : index
    %c1_39 = arith.constant 1 : index
    %c0_40 = arith.constant 0 : index
    %41 = vector.load %arg4[%c0_38, %c1_39, %c0_40] : memref<3x10x128xf32, #tpu.memory_space<vmem>>, vector<1x8x128xf32>
    %42 = vector.shape_cast %41 : vector<1x8x128xf32> to vector<8x128xf32>
    %43 = arith.subf %42, %25 : vector<8x128xf32>
    %44 = math.absf %43 : vector<8x128xf32>
    %45 = arith.addf %40, %44 : vector<8x128xf32>
    %c2_41 = arith.constant 2 : index
    %c1_42 = arith.constant 1 : index
    %c0_43 = arith.constant 0 : index
    %46 = vector.load %arg4[%c2_41, %c1_42, %c0_43] : memref<3x10x128xf32, #tpu.memory_space<vmem>>, vector<1x8x128xf32>
    %47 = vector.shape_cast %46 : vector<1x8x128xf32> to vector<8x128xf32>
    %48 = arith.subf %47, %25 : vector<8x128xf32>
    %49 = math.absf %48 : vector<8x128xf32>
    %50 = arith.addf %45, %49 : vector<8x128xf32>
    %c1_44 = arith.constant 1 : index
    %c2_45 = arith.constant 2 : index
    %c0_46 = arith.constant 0 : index
    %51 = vector.load %arg4[%c1_44, %c2_45, %c0_46] : memref<3x10x128xf32, #tpu.memory_space<vmem>>, vector<1x8x128xf32>
    %52 = vector.shape_cast %51 : vector<1x8x128xf32> to vector<8x128xf32>
    %53 = arith.subf %52, %25 : vector<8x128xf32>
    %54 = math.absf %53 : vector<8x128xf32>
    %55 = arith.addf %50, %54 : vector<8x128xf32>
    %cst_47 = arith.constant 0.699999988 : f32
    %56 = vector.broadcast %cst_47 : f32 to vector<8x128xf32>
    %57 = arith.mulf %55, %56 : vector<8x128xf32>
    %58 = arith.addf %36, %57 : vector<8x128xf32>
    %59 = vector.shape_cast %58 : vector<8x128xf32> to vector<1x8x128xf32>
    %cst_48 = arith.constant dense<0.000000e+00> : vector<8x128xf32>
    %60 = vector.multi_reduction <add>, %59, %cst_48 [0] : vector<1x8x128xf32> to vector<8x128xf32>
    %61 = tpu.iota {dimensions = array<i32: 1>} : vector<8x128xi32>
    %c16_i32 = arith.constant 16 : i32
    %62 = vector.broadcast %c16_i32 : i32 to vector<8x128xi32>
    %63 = arith.cmpi slt, %61, %62 : vector<8x128xi32>
    %cst_49 = arith.constant 0.000000e+00 : f32
    %64 = vector.broadcast %cst_49 : f32 to vector<8x128xf32>
    %65 = arith.select %63, %60, %64 : vector<8x128xi1>, vector<8x128xf32>
    %c0_50 = arith.constant 0 : index
    %c0_51 = arith.constant 0 : index
    %c0_52 = arith.constant 0 : index
    %66 = vector.load %arg3[%c0_50, %c0_51, %c0_52] : memref<1x8x128xf32, #tpu.memory_space<vmem>>, vector<1x8x128xf32>
    %67 = vector.shape_cast %66 : vector<1x8x128xf32> to vector<8x128xf32>
    %68 = vector.shape_cast %65 : vector<8x128xf32> to vector<1x8x128xf32>
    tpu.vector_store %arg3[%c0_50, %c0_51, %c0_52], %68 {strides = array<i32>} : memref<1x8x128xf32, #tpu.memory_space<vmem>>, vector<1x8x128xf32>,
    return
  }
  func.func @transform_0(%arg0: i32) -> (i32, i32) {
    %c0_i32 = arith.constant 0 : i32
    %c0_i32_0 = arith.constant 0 : i32
    return %arg0, %c0_i32 : i32, i32
  }
  func.func @transform_1(%arg0: i32) -> (i32, i32) {
    %c1_i32 = arith.constant 1 : i32
    %0 = arith.addi %arg0, %c1_i32 : i32
    %c1_i32_0 = arith.constant 1 : i32
    %1 = arith.muli %0, %c1_i32_0 : i32
    %c0_i32 = arith.constant 0 : i32
    %c0_i32_1 = arith.constant 0 : i32
    return %1, %c0_i32 : i32, i32
  }
  func.func @transform_2(%arg0: i32) -> (i32, i32, i32) {
    %c0_i32 = arith.constant 0 : i32
    %c0_i32_0 = arith.constant 0 : i32
    %c0_i32_1 = arith.constant 0 : i32
    return %arg0, %c0_i32, %c0_i32_0 : i32, i32, i32
  }
}

</mosaic_0001>

<bundles_post_ra>
// kernel: tpu_custom_call.1
= control target key start
LH: loop header
LB: loop body
LE: loop exit
PB: predicated region body
PF: predicated region fallthrough
CT: control target
= control target key end

     0   :  { %s895_s0 = inlined_call_operand.hbm [shape: f32[24,256], index: 0, kind: input, shape index: {}]   ;;  %s896_s1 = inlined_call_operand.hbm [shape: f32[24,256], index: 1, kind: input, shape index: {}]   ;;  %s897_s2 = inlined_call_operand.hbm [shape: f32[2,8,128], index: 2, kind: output, shape index: {}]  }
   0x1   :  { %904 = sst [smem:[#allocation12_spill]] %s895_s0 }
   0x2   :  { %7 = vsyncpa [#allocation4], 0 }
   0x3   :  { %9 = vsyncpa [#allocation4 + $0x1], 0 }
   0x4   :  { %10 = vsyncpa [#allocation7], 0 }
   0x5   :  { %12 = vsyncpa [#allocation7 + $0x1], 0 }
   0x6   :  { %13 = vsyncpa [#allocation5], 0 }
   0x7   :  { %15 = vsyncpa [#allocation5 + $0x1], 0  ;;  %s659_s9 = smov 0   ;;  %s661_s10 = smov 0  }
   0x8   :  { %s663_s11 = smov 0   ;;  %s665_s12 = smov 0  }
   0x9   :  { %s667_s13 = smov 0   ;;  %s669_s14 = smov 0  }
   0xa   :  { %s671_s15 = smov 0  }
   0xb LB: > { %s695_s16 = sadd.s32 4294967295, %s637_s15   ;;  %s394_s17 = sadd.s32 4294967294, %s637_s15   ;;  %s637_s15 = sphi %s671_s15, %s931_s15   ;;  %s633_s14 = sphi %s669_s14, %s930_s14   ;;  %s629_s13 = sphi %s667_s13, %s929_s13   ;;  %s625_s12 = sphi %s665_s12, %s928_s12   ;;  %s621_s11 = sphi %s663_s11, %s927_s11   ;;  %s617_s10 = sphi %s661_s10, %s926_s10   ;;  %s613_s9 = sphi %s659_s9, %s925_s9  }
   0xc   : > { %s699_s18 = sadd.s32 1, %s637_s15   ;;  %s28_s19 = sadd.s32 1, %s633_s14 }
   0xd   : > { %s25_s20 = ssub.s32 %s637_s15, %s699_s18  ;;  %p35_p0 = scmp.ne.s32.totalorder %s633_s14, %s629_s13 }
   0xe   : > { %p26_p1 = scmp.eq.s32.totalorder %s25_s20, 0  ;;  %p900_p2 = scmp.eq.s32.totalorder %s637_s15, 0 }
   0xf   : > { %p41_p3 = scmp.ne.s32.totalorder %s629_s13, %s625_s12  ;;  %p899_p4 = scmp.eq.s32.totalorder %s695_s16, 0 }
  0x10   : > { %s711_s21 = scalar_select %p26_p1, %s633_s14, %s28_s19  }
  0x11   : > { %p715_p5 = por %p900_p2, %p35_p0  ;;  %p721_p6 = por %p899_p4, %p41_p3 }
  0x12   : > { %p93_p7 = scmp.eq.s32.totalorder %s695_s16, 1  ;;  %p99_p8 = scmp.eq.s32.totalorder %s394_s17, 1 }
  0x13   : > { %s906_s23 = scalar_select %p721_p6, 1, 0 }
  0x14   : > { %p898_p10 = scmp.lt.s32.totalorder %s637_s15, 2  ;;  %p728_p11 = por %p93_p7, %p35_p0 }
  0x15   : > { %p732_p12 = por %p99_p8, %p41_p3  ;;  %s119_s26 = sand.u32 1, %s633_s14  }
  0x16   : > { %s907_s24 = scalar_select %p728_p11, 1, 0 }
  0x17   : > { %s908_s25 = scalar_select %p732_p12, 1, 0 }
  0x18   : > { %s410_s27 = sshll.u32 %s637_s15, 8  ;;  %s397_s28 = sshll.u32 %s119_s26, 4 }
  0x19   : > { %s909_s0 = sld [smem:[#allocation12_spill]]  ;;  %s123_s4 = scalar_lea.vmem [#allocation3], %s397_s28 }
  0x1a   : > { %s131_s5 = sshll.u32 %s123_s4, 4  ;;  %p749_p13 = pnand %p898_p10, %p715_p5  ;;  %s753_s5 = int_to_ptr.vmem [resolvable:$true] %s131_s5 }
  0x1b   : > { %s120_s7 = scalar_lea.sflag [#allocation4], %s119_s26 }
  0x1c   : > { %p490_p7 = pneg %p749_p13 }
  0x1f   : > { %s743_s3 = scalar_lea.hbm %s909_s0, %s410_s27  ;;  %s493_s20 = scalar_lea.hbm %s909_s0, 768 }
  0x20   : > { %s488_s8 = scalar_lea.hbm %s743_s3, 256  ;;  %p494_p5 = scmp.lt.s32.totalorder %s743_s3, %s909_s0 }
  0x21   : > { %p489_p3 = scmp.ne.s32.totalorder %s743_s3, %s488_s8  ;;  %p495_p10 = scmp.lt.s32.totalorder %s493_s20, %s488_s8 }
  0x23   : > { %p491_p8 = pnand %p490_p7, %p489_p3  ;;  %p496_p4 = por %p495_p10, %p494_p5 }
  0x25   : > { %p492_p9 = pneg %p491_p8 }
  0x27   : > { %p497_p2 = pnand %p496_p4, %p492_p9 }
  0x29   : > { %500 = shalt.err (!%p497_p2)
}
  0x2a   : > { %s501_s26 = scalar_lea.vmem %s753_s5, 256  ;;  %s639_s29 = smov [#allocation3]  }
  0x2b   : > { %p502_p0 = scmp.ne.s32.totalorder %s753_s5, %s501_s26  ;;  %s506_s30 = sshll.u32 %s639_s29, 4  ;;  %s507_s30 = int_to_ptr.vmem [resolvable:$false] %s506_s30 }
  0x2c   : > { %s508_s4 = scalar_lea.vmem %s507_s30, 512  ;;  %p509_p8 = scmp.lt.s32.totalorder %s753_s5, %s507_s30 }
  0x2d   : > { %p504_p1 = pnand %p502_p0, %p490_p7  ;;  %p510_p12 = scmp.lt.s32.totalorder %s508_s4, %s501_s26 }
  0x2f   : > { %p505_p3 = pneg %p504_p1  ;;  %p511_p11 = por %p510_p12, %p509_p8 }
  0x31   : > { %p512_p6 = pnand %p511_p11, %p505_p3 }
  0x33   : > { %515 = shalt.err (!%p512_p6)
}
  0x34   : > { %420 = dma.hbm_to_vmem [thread:$0]  (!%p749_p13), %s743_s3, 256, %s753_s5, %s120_s7  }
  0x35   : > { %p911_p2 = scmp.lt.s32.totalorder %s637_s15, 3  ;;  %p912_p4 = scmp.ge.s32.totalorder %s637_s15, 1 }
  0x36   : > { %s52_s8 = sadd.s32 1, %s699_s18  ;;  %s56_s19 = sadd.s32 1, %s621_s11 }
  0x37   : > { %p779_p6 = pnand %p912_p4, %p911_p2  ;;  %s53_s17 = ssub.s32 %s699_s18, %s52_s8 }
  0x38   : > { %p54_p9 = scmp.eq.s32.totalorder %s53_s17, 0  ;;  %p63_p10 = scmp.ne.s32.totalorder %s621_s11, %s617_s10 }
  0x39   : > { %s913_s6 = scalar_select %p779_p6, 1, 0 }
  0x3a   : > { %p69_p11 = scmp.ne.s32.totalorder %s617_s10, %s613_s9  ;;  %s138_s20 = sand.u32 1, %s621_s11  }
  0x3b   : > { %s792_s22 = scalar_select %p54_p9, %s621_s11, %s56_s19  }
  0x3c   : > { %p914_p12 = scmp.eq.s32.totalorder %s637_s15, 0  ;;  %p915_p1 = scmp.eq.s32.totalorder %s695_s16, 0 }
  0x3d   : > { %s400_s5 = sshll.u32 %s138_s20, 4  ;;  %s336_s26 = scalar_lea.hbm %s896_s1, %s410_s27 }
  0x3e   : > { %p65_p0 = por %p63_p10, %p914_p12  ;;  %p798_p13 = por %p69_p11, %p915_p1 }
  0x3f   : > { %s807_s29 = scalar_lea.hbm %s336_s26, 256  ;;  %s142_s9 = scalar_lea.vmem [#allocation6], %s400_s5 }
  0x40   : > { %s916_s3 = scalar_select %p798_p13, 1, 0 }
  0x41   : > { %s151_s30 = sshll.u32 %s142_s9, 4  ;;  %p917_p7 = scmp.lt.s32.totalorder %s637_s15, 2  ;;  %s152_s30 = int_to_ptr.vmem [resolvable:$true] %s151_s30 }
  0x42   : > { %s139_s8 = scalar_lea.sflag [#allocation7], %s138_s20  ;;  %s544_s17 = scalar_lea.hbm %s336_s26, 512 }
  0x43   : > { %p811_p5 = pnand %p917_p7, %p65_p0  ;;  %p517_p3 = scmp.ne.s32.totalorder %s807_s29, %s544_s17 }
  0x44   : > { %s521_s7 = scalar_lea.hbm %s896_s1, 768  ;;  %p522_p9 = scmp.lt.s32.totalorder %s807_s29, %s896_s1 }
  0x45   : > { %p518_p8 = pneg %p811_p5  ;;  %p523_p10 = scmp.lt.s32.totalorder %s521_s7, %s544_s17 }
  0x47   : > { %p519_p2 = pnand %p518_p8, %p517_p3  ;;  %p524_p11 = por %p523_p10, %p522_p9 }
  0x49   : > { %p520_p4 = pneg %p519_p2 }
  0x4b   : > { %p525_p12 = pnand %p524_p11, %p520_p4 }
  0x4d   : > { %528 = shalt.err (!%p525_p12)
}
  0x4e   : > { %s529_s9 = scalar_lea.vmem %s152_s30, 256  ;;  %s640_s20 = smov [#allocation6]  }
  0x4f   : > { %p530_p0 = scmp.ne.s32.totalorder %s152_s30, %s529_s9  ;;  %s534_s26 = sshll.u32 %s640_s20, 4  ;;  %s535_s26 = int_to_ptr.vmem [resolvable:$false] %s534_s26 }
  0x50   : > { %s536_s0 = scalar_lea.vmem %s535_s26, 512  ;;  %p537_p3 = scmp.lt.s32.totalorder %s152_s30, %s535_s26 }
  0x51   : > { %p532_p1 = pnand %p530_p0, %p518_p8  ;;  %p538_p2 = scmp.lt.s32.totalorder %s536_s0, %s529_s9 }
  0x53   : > { %p533_p7 = pneg %p532_p1  ;;  %p539_p13 = por %p538_p2, %p537_p3 }
  0x55   : > { %p540_p6 = pnand %p539_p13, %p533_p7 }
  0x57   : > { %543 = shalt.err (!%p540_p6)
}
  0x58   : > { %423 = dma.hbm_to_vmem [thread:$0]  (!%p811_p5), %s807_s29, 256, %s152_s30, %s139_s8  }
  0x59   : > { %p919_p4 = scmp.ne.s32.totalorder %s913_s6, 0 }
  0x5a   : > { %s831_s17 = sand.u32 (!%p919_p4), 1, %s629_s13   ;;  %p920_p8 = scmp.ne.s32.totalorder (!%p919_p4), %s906_s23, 0 }
  0x5b   : > { %160 = sbr.rel (%p919_p4) target bundleno = 265 (0x109), region = 28  ;;  %s403_s27 = sshll.u32 (!%p919_p4), %s831_s17, 4 }
  0x5c   : > { %s163_s19 = scalar_lea.sflag (!%p919_p4), [#allocation4], %s831_s17  ;;  %s166_s7 = scalar_lea.vmem (!%p919_p4), [#allocation3], %s403_s27 }
  0x60   : > { %600 = dma.done.wait (%p920_p8), %s163_s19, 256  }
  0x61   : > { %602 = vsyncadd (%p920_p8), %s163_s19, 4294967040  ;;  %s171_s0 = sand.u32 1, %s617_s10   ;;  %p921_p6 = scmp.ne.s32.totalorder %s916_s3, 0 }
  0x62   : > { %s404_s29 = sshll.u32 %s171_s0, 4  ;;  %s172_s6 = scalar_lea.sflag [#allocation7], %s171_s0 }
  0x63   : > { %s175_s30 = scalar_lea.vmem [#allocation6], %s404_s29 }
  0x64   : > { %604 = dma.done.wait (%p921_p6), %s172_s6, 256  }
  0x65   : > { %606 = vsyncadd (%p921_p6), %s172_s6, 4294967040  ;;  %v219_v0 = vld [vmem:[%s175_s30] sm:$0x3]  ;;  %s641_s4 = smov 127   ;;  %v220_v2 = vld [vmem:[%s175_s30 + $0x8] sm:$0x3]  ;;  %v281_v34 = vlaneseq }
  0x66   : > { %v206_v1 = vld [vmem:[%s166_s7] sm:$0xff]  ;;  %223 = vrot.lane.b32.xlu1 %v219_v0, %s641_s4  ;;  %v207_v3 = vld [vmem:[%s166_s7 + $0x8] sm:$0xff]  ;;  %s642_s23 = smov 126   ;;  %vm214_vm0 = vcmask 1039360   ;;  %vm238_vm1 = vcmask 1031168   ;;  %s405_s3 = sshll.u32 %s831_s17, 3 }
  0x67   : > { %210 = vrot.lane.b32.xlu0 %v206_v1, %s641_s4  ;;  %203 = vst [vmem:[#allocation2] sm:$0xff] %v206_v1  ;;  %v204_v4 = vld [vmem:[%s175_s30] sm:$0x3]  ;;  %v244_v5 = vld [vmem:[%s175_s30 + $0x8] sm:$0x3]  ;;  %v282_v40 = vand.u32 127, %v281_v34 }
  0x68   : > { %205 = vst [vmem:[#allocation2 + $0x8] sm:$0x3] %v204_v4  ;;  %v243_v6 = vld [vmem:[%s175_s30] sm:$0x3]  ;;  %s407_s8 = sshll.u32 %s695_s16, 7  ;;  %s200_s5 = scalar_lea.vmem [#allocation8], %s405_s3 }
  0x69   : > { %s300_s28 = sshll.u32 %s200_s5, 4  ;;  %vm283_vm2 = vcmp.lt.s32.totalorder %v282_v40, 16  ;;  %s849_s26 = scalar_lea.hbm %s897_s2, %s407_s8  ;;  %s301_s28 = int_to_ptr.vmem [resolvable:$true] %s300_s28 }
  0x6a   : > { %225 = vrot.lane.b32.xlu1 %v220_v2, %s641_s4  ;;  %s287_s27 = scalar_lea.sflag [#allocation5], %s831_s17  ;;  %s545_s19 = scalar_lea.vmem %s301_s28, 128 }
  0x6b   : > { %212 = vrot.lane.b32.xlu0 %v207_v3, %s641_s4  ;;  %p546_p13 = scmp.ne.s32.totalorder %s301_s28, %s545_s19  ;;  %p922_p5 = scmp.ne.s32.totalorder %s907_s24, 0 }
  0x6c   : > { %s643_s7 = smov [#allocation8]  }
  0x6d   : > { %p547_p9 = pnand %p546_p13, %p922_p5  ;;  %s549_s16 = sshll.u32 %s643_s7, 4  ;;  %s550_s16 = int_to_ptr.vmem [resolvable:$false] %s549_s16 }
  0x6e   : > { %236 = vrot.lane.b32.xlu1 %v207_v3, %s642_s23  ;;  %s551_s0 = scalar_lea.vmem %s550_s16, 256  ;;  %p552_p11 = scmp.lt.s32.totalorder %s301_s28, %s550_s16 }
  0x6f   : > { %234 = vrot.lane.b32.xlu0 %v206_v1, %s642_s23  ;;  %v266_v20 = vld [vmem:[#allocation2 + $0x1] sm:$0xff]  ;;  %p548_p10 = pneg %p547_p9  ;;  %p553_p12 = scmp.lt.s32.totalorder %s551_s0, %s545_s19 }
  0x70   : > { %v258_v21 = vld [vmem:[#allocation2 + $0x2] sm:$0xff] }
  0x71   : > { %p554_p0 = por %p553_p12, %p552_p11 }
  0x72   : > { %249 = vrot.lane.b32.xlu1 %v244_v5, %s642_s23 }
  0x73   : > { %247 = vrot.lane.b32.xlu0 %v243_v6, %s642_s23  ;;  %p555_p1 = pnand %p554_p0, %p548_p10 }
  0xd8   : > { %v224_v7 = vpop.permute.xlu1 %223 }
  0xd9   : > { %v211_v8 = vpop.permute.xlu0 %210 }
  0xdc   : > { %v226_v9 = vpop.permute.xlu1 %225 }
  0xdd   : > { %v213_v10 = vpop.permute.xlu0 %212  ;;  %v227_v11 = vsel %vm214_vm0, %v224_v7, %v226_v9 }
  0xde   : > { %v215_v12 = vsel %vm214_vm0, %v211_v8, %v213_v10  ;;  %229 = vst [vmem:[#allocation2 + $0x18] sm:$0x3] %v227_v11 }
  0xdf   : > { %218 = vst [vmem:[#allocation2 + $0x10] sm:$0xff] %v215_v12 }
  0xe0   : > { %v237_v13 = vpop.permute.xlu1 %236 }
  0xe1   : > { %v235_v14 = vpop.permute.xlu0 %234 }
  0xe2   : > { %v239_v15 = vsel %vm238_vm1, %v235_v14, %v237_v13 }
  0xe3   : > { %242 = vst [vmem:[#allocation2 + $0x20] sm:$0xff] %v239_v15 }
  0xe4   : > { %v250_v16 = vpop.permute.xlu1 %249 }
  0xe5   : > { %v248_v17 = vpop.permute.xlu0 %247 }
  0xe6   : > { %v251_v18 = vsel %vm238_vm1, %v248_v17, %v250_v16  ;;  %v254_v19 = vld [vmem:[#allocation2 + $0x11] sm:$0xff] }
  0xe7   : > { %253 = vst [vmem:[#allocation2 + $0x28] sm:$0x3] %v251_v18  ;;  %v264_v22 = vsub.f32 %v215_v12, %v254_v19  ;;  %v267_v23 = vsub.f32 %v266_v20, %v254_v19  ;;  %v256_v24 = vsub.f32 %v239_v15, %v254_v19  ;;  %v259_v25 = vsub.f32 %v258_v21, %v254_v19  ;;  %v274_v26 = vld [vmem:[#allocation2 + $0x12] sm:$0xff] }
  0xe8   : > { %v275_v33 = vsub.f32 %v274_v26, %v254_v19 }
  0xe9   : > { %v265_v27 = vand.u32 2147483647, %v264_v22  ;;  %v268_v28 = vand.u32 2147483647, %v267_v23  ;;  %v257_v30 = vand.u32 2147483647, %v256_v24 }
  0xea   : > { %v260_v31 = vand.u32 2147483647, %v259_v25  ;;  %v276_v39 = vand.u32 2147483647, %v275_v33 }
  0xeb   : > { %v269_v35 = vadd.f32 %v268_v28, %v265_v27 }
  0xec   : > { %v261_v37 = vadd.f32 %v260_v31, %v257_v30 }
  0xee   : > { %v270_v29 = vld [vmem:[#allocation2 + $0x21] sm:$0xff]  ;;  %v262_v42 = vmul.f32 0.49, %v261_v37 }
  0xef   : > { %v271_v32 = vsub.f32 %v270_v29, %v254_v19 }
  0xf1   : > { %v272_v36 = vand.u32 2147483647, %v271_v32 }
  0xf3   : > { %v273_v38 = vadd.f32 %v272_v36, %v269_v35 }
  0xf5   : > { %v277_v41 = vadd.f32 %v276_v39, %v273_v38 }
  0xf7   : > { %v278_v43 = vmul.f32 0.7, %v277_v41 }
  0xf9   : > { %v279_v44 = vadd.f32 %v278_v43, %v262_v42 }
  0xfb   : > { %v284_v45 = vsel %vm283_vm2, %v279_v44, 0.0 }
  0xfc   : > { %285 = vst [vmem:[%s200_s5] sm:$0xff] %v284_v45 }
  0xfd   : > { %558 = shalt.err (!%p555_p1)
}
  0xfe   : > { %s559_s29 = scalar_lea.hbm %s849_s26, 128  ;;  %s563_s30 = scalar_lea.hbm %s897_s2, 256 }
  0xff   : > { %p560_p7 = scmp.ne.s32.totalorder %s849_s26, %s559_s29  ;;  %p564_p4 = scmp.lt.s32.totalorder %s849_s26, %s897_s2 }
 0x100   : > { %p565_p8 = scmp.lt.s32.totalorder %s563_s30, %s559_s29 }
 0x101   : > { %p561_p3 = pnand %p560_p7, %p922_p5 }
 0x102   : > { %p566_p6 = por %p565_p8, %p564_p4 }
 0x103   : > { %p562_p2 = pneg %p561_p3 }
 0x105   : > { %p567_p13 = pnand %p566_p6, %p562_p2 }
 0x107   : > { %570 = shalt.err (!%p567_p13)
}
 0x108   : > { %415 = dma.vmem_to_hbm [thread:$0]  (%p922_p5), %s301_s28, 128, %s849_s26, %s287_s27  }
 0x109 PF: > { %s312_s3 = sand.u32 1, %s625_s12   ;;  %p923_p9 = scmp.ne.s32.totalorder %s908_s25, 0 }
 0x10a   : > { %p924_p10 = scmp.ge.s32.totalorder %s637_s15, 2  ;;  %s313_s8 = scalar_lea.sflag [#allocation5], %s312_s3 }
 0x10c   : > { %p425_p11 = pnand %p924_p10, %p923_p9 }
 0x10e   : > { %p426_p12 = pneg %p425_p11 }
 0x110   : > { %608 = dma.done.wait (%p426_p12), %s313_s8, 128  }
 0x111   : > { %610 = vsyncadd (%p426_p12), %s313_s8, 4294967168  ;;  %p18_p5 = scmp.ge.s32.totalorder %s699_s18, 4   ;;  %s925_s9 = smov %s617_s10 }
 0x112   : > { %s926_s10 = smov %s621_s11  ;;  %s927_s11 = smov %s792_s22 }
 0x113   : > { %s928_s12 = smov %s629_s13  ;;  %s929_s13 = smov %s633_s14 }
 0x114   : > { %s930_s14 = smov %s711_s21  ;;  %s931_s15 = smov %s699_s18 }
 0x115   :  { %20 = sbr.rel (!%p18_p5) target bundleno = 11 (0xb), region = 88 }
 0x11a   :  { %318 = vsyncpa [#allocation4], 1 }
 0x11b   :  { %320 = vsyncpa [#allocation4 + $0x1], 1 }
 0x11c   :  { %321 = vsyncpa [#allocation7], 1 }
 0x11d   :  { %323 = vsyncpa [#allocation7 + $0x1], 1 }
 0x11e   :  { %324 = vsyncpa [#allocation5], 1 }
 0x11f   :  { %326 = vsyncpa [#allocation5 + $0x1], 1 }

</bundles_post_ra>
